<compile_context>
chip_gen: v5e
topology: v5e:2x2
jax: 0.10.0
libtpu: 0.0.40
codegen_flags: <defaults>
</compile_context>

<pallas_src>
import math

import jax
import jax.numpy as jnp
import numpy as np
from jax.experimental import pallas as pl
from jax.experimental.pallas import tpu as pltpu

# ----------------------- hyper-parameters (small, synthetic) -----------------------
B = 2            # batch
T = 8            # sequence length
DIM = 16         # input feature dim (TEmbeddings `dim`)
D_MODEL = 32     # opts.d_model
LEVELS = 2       # opts.levels
KSIZE = 3        # opts.ksize
# opts.dropout is irrelevant at inference (identity).

R = B * T                     # flattened rows (batch*time)
SQRT_D = math.sqrt(D_MODEL)
SLAB_W = 128                  # lane-dense parameter-slab width


def _align8(n):
    return (n + 7) // 8 * 8


def _build_layout():
    """Row offsets of every parameter block inside the packed slab (all 8-aligned)."""
    layout = []
    off = 0
    for lvl in range(LEVELS):
        cin = DIM if lvl == 0 else D_MODEL
        fuse_dw = cin != D_MODEL
        ent = {"cin": cin, "dilation": 2 ** lvl, "fuse_dw": fuse_dw,
               "w1_width": (2 * D_MODEL) if fuse_dw else D_MODEL}
        ent["w1"] = off; off += _align8(KSIZE * cin)       # (K*cin, d_model [+ d_model fused dw])
        ent["w2"] = off; off += _align8(KSIZE * D_MODEL)   # (K*d_model, d_model)
        ent["bias"] = off; off += 8                        # one row: [b_c1 | b_c2 | b_dw]
        layout.append(ent)
    shifts = sorted({(KSIZE - 1 - k) * (2 ** l)
                     for l in range(LEVELS) for k in range(KSIZE)} - {0})
    mask_row = off
    mask_cols = {s: i for i, s in enumerate(shifts)}       # one (R,1) 0/1 mask column per shift
    off += _align8(R)
    assert KSIZE * max(DIM, D_MODEL) <= SLAB_W             # im2col width fits one MXU pass
    assert 3 * D_MODEL <= SLAB_W and len(shifts) <= SLAB_W
    return layout, mask_row, mask_cols, off


LAYOUT, MASK_ROW, MASK_COLS, SLAB_ROWS = _build_layout()


# --------------------------------- Pallas kernel -----------------------------------
def _shifted(p_ref, x, shift):
    """x[r] -> x[r - shift] with zeroed history at every sequence start (Chomp1d + batch edge).
    XLU sublane roll + VPU mask multiply -- no MXU work (replaces the old (R,R) shift matmuls)."""
    if shift == 0:
        return x
    col = MASK_COLS[shift]
    mask = p_ref[MASK_ROW:MASK_ROW + R, col:col + 1]             # (R, 1) 0/1 f32
    return pltpu.roll(x, shift, axis=0) * mask


def _im2col(p_ref, x, dilation):
    """(R, cin) f32 -> (R, K*cin) bf16: the K causally shifted copies concatenated along lanes."""
    taps = [_shifted(p_ref, x, (KSIZE - 1 - k) * dilation) for k in range(KSIZE)]
    return jnp.concatenate(taps, axis=1).astype(jnp.bfloat16)


def _temb_kernel(x_ref, p_ref, o_ref):
    h = x_ref[...]                                               # (R, DIM) f32
    for ent in LAYOUT:                                           # static unroll over levels
        cin, dil, brow = ent["cin"], ent["dilation"], ent["bias"]
        b1 = p_ref[brow:brow + 1, 0:D_MODEL]
        b2 = p_ref[brow:brow + 1, D_MODEL:2 * D_MODEL]

        # conv1 (+ fused 1x1 residual downsample at level 0): ONE bf16 MXU dot.
        w1 = p_ref[ent["w1"]:ent["w1"] + KSIZE * cin,
                   0:ent["w1_width"]].astype(jnp.bfloat16)
        y1 = jnp.dot(_im2col(p_ref, h, dil), w1, preferred_element_type=jnp.float32)
        a = jnp.maximum(y1[:, 0:D_MODEL] + b1, 0.0)
        if ent["fuse_dw"]:
            bd = p_ref[brow:brow + 1, 2 * D_MODEL:3 * D_MODEL]
            res = y1[:, D_MODEL:2 * D_MODEL] + bd                # residual projection, same dot
        else:
            res = h

        # conv2: ONE bf16 MXU dot.
        w2 = p_ref[ent["w2"]:ent["w2"] + KSIZE * D_MODEL,
                   0:D_MODEL].astype(jnp.bfloat16)
        y2 = jnp.dot(_im2col(p_ref, a, dil), w2, preferred_element_type=jnp.float32)
        a2 = jnp.maximum(y2 + b2, 0.0)

        h = jnp.maximum(a2 + res, 0.0)                           # TemporalBlock final ReLU
    o_ref[...] = h * SQRT_D                                      # TEmbeddings * sqrt(d_model)


@jax.jit
def temb_forward(x, slab):
    """x: (B, T, DIM) f32, slab: packed params -> (B, T, D_MODEL) f32."""
    x_flat = x.reshape(R, DIM)
    # Gridless single call, everything resident in VMEM (~190 KiB total): 3 DMAs, no pipeline
    # bookkeeping.  Scale-up note: batch more rows per call (R >= 128) and add a row-tile grid
    # axis marked "parallel" to use both TensorCores on v7x.
    out = pl.pallas_call(
        _temb_kernel,
        out_shape=jax.ShapeDtypeStruct((R, D_MODEL), jnp.float32),
        in_specs=[pl.BlockSpec(memory_space=pltpu.MemorySpace.VMEM),
                  pl.BlockSpec(memory_space=pltpu.MemorySpace.VMEM)],
        out_specs=pl.BlockSpec(memory_space=pltpu.MemorySpace.VMEM),
    )(x_flat, slab)
    return out.reshape(B, T, D_MODEL)


# ------------------------------ host-side packing -----------------------------------
def _stack_taps(w):
    """(Cout, Cin, K) conv weight -> (K*Cin, Cout) block-stacked for the im2col dot."""
    cout, cin, k = w.shape
    return np.transpose(np.asarray(w), (2, 1, 0)).reshape(k * cin, cout)


def pack_params(raw):
    """Pack all conv weights/biases + causal masks into one (SLAB_ROWS, 128) f32 slab."""
    slab = np.zeros((SLAB_ROWS, SLAB_W), np.float32)
    for ent, p in zip(LAYOUT, raw):
        cin = ent["cin"]
        slab[ent["w1"]:ent["w1"] + KSIZE * cin, 0:D_MODEL] = _stack_taps(p["w1"])
        slab[ent["w2"]:ent["w2"] + KSIZE * D_MODEL, 0:D_MODEL] = _stack_taps(p["w2"])
        slab[ent["bias"], 0:D_MODEL] = np.asarray(p["b1"])
        slab[ent["bias"], D_MODEL:2 * D_MODEL] = np.asarray(p["b2"])
        if ent["fuse_dw"]:
            # The 1x1 downsample reads the UNSHIFTED input, i.e. im2col tap k = KSIZE-1: put its
            # weights in those rows, lanes [D_MODEL:2*D_MODEL], so conv1 + residual share one dot.
            r0 = ent["w1"] + (KSIZE - 1) * cin
            slab[r0:r0 + cin, D_MODEL:2 * D_MODEL] = np.asarray(p["wd"])[:, :, 0].T
            slab[ent["bias"], 2 * D_MODEL:3 * D_MODEL] = np.asarray(p["bd"])
    rows = np.arange(R)
    for s, col in MASK_COLS.items():                 # (R,1) 0/1 causal/batch masks per shift
        slab[MASK_ROW:MASK_ROW + R, col] = ((rows % T) >= s).astype(np.float32)
    return jnp.asarray(slab)


def _weight_norm(v, g):
    # torch weight_norm(dim=0): w = g * v / ||v||, norm over (Cin, K) per output channel.
    norm = jnp.sqrt(jnp.sum(v * v, axis=(1, 2), keepdims=True))
    return v * (g[:, None, None] / norm)


def init_params(key):
    raw = []
    for lvl in range(LEVELS):
        cin = DIM if lvl == 0 else D_MODEL
        key, *ks = jax.random.split(key, 9)
        w1 = _weight_norm(0.3 * jax.random.normal(ks[0], (D_MODEL, cin, KSIZE), jnp.float32),
                          1.0 + 0.1 * jax.random.normal(ks[1], (D_MODEL,), jnp.float32))
        b1 = 0.1 * jax.random.normal(ks[2], (D_MODEL,), jnp.float32)
        w2 = _weight_norm(0.3 * jax.random.normal(ks[3], (D_MODEL, D_MODEL, KSIZE), jnp.float32),
                          1.0 + 0.1 * jax.random.normal(ks[4], (D_MODEL,), jnp.float32))
        b2 = 0.1 * jax.random.normal(ks[5], (D_MODEL,), jnp.float32)
        p = {"w1": w1, "b1": b1, "w2": w2, "b2": b2, "wd": None, "bd": None}
        if cin != D_MODEL:
            p["wd"] = 0.3 * jax.random.normal(ks[6], (D_MODEL, cin, 1), jnp.float32)
            p["bd"] = 0.1 * jax.random.normal(ks[7], (D_MODEL,), jnp.float32)
        raw.append(p)
    return raw


# ------------------------------ pure-JAX reference ----------------------------------
def _ref_causal_conv(x_nct, w, b, dilation):
    k = w.shape[-1]
    pad = (k - 1) * dilation
    y = jax.lax.conv_general_dilated(
        x_nct, w, window_strides=(1,), padding=[(pad, pad)],
        rhs_dilation=(dilation,), dimension_numbers=("NCH", "OIH", "NCH"),
        precision=jax.lax.Precision.HIGHEST)
    return y[:, :, :x_nct.shape[-1]] + b[None, :, None]          # Chomp1d + bias


def temb_reference(x, raw):
    h = jnp.transpose(x, (0, 2, 1))                              # (B, C, T)
    for lvl, p in enumerate(raw):
        d = 2 ** lvl
        a = jax.nn.relu(_ref_causal_conv(h, p["w1"], p["b1"], d))
        a = jax.nn.relu(_ref_causal_conv(a, p["w2"], p["b2"], d))
        res = h if p["wd"] is None else _ref_causal_conv(h, p["wd"], p["bd"], 1)
        h = jax.nn.relu(a + res)
    return jnp.transpose(h, (0, 2, 1)) * math.sqrt(D_MODEL)


if __name__ == "__main__":
    key = jax.random.PRNGKey(0)
    k_x, k_p = jax.random.split(key)
    x = jax.random.normal(k_x, (B, T, DIM), jnp.float32)
    raw = init_params(k_p)
    slab = pack_params(raw)

    out = temb_forward(x, slab)
    jax.block_until_ready(out)
    assert out.shape == (B, T, D_MODEL), out.shape

    ref = temb_reference(x, raw)
    # Kernel uses bf16 MXU operands (reference uses Precision.HIGHEST) and the output carries the
    # *sqrt(d_model)=5.66 scaling, so the absolute tolerance is scaled accordingly; relative
    # error stays well under 2%.
    np.testing.assert_allclose(np.asarray(out), np.asarray(ref), rtol=2e-2, atol=1.5e-1)
    print("KERNEL_OK")
</pallas_src>

<mosaic_0001>
module attributes {stable_mosaic.version = 11 : i64} {
  func.func @_temb_kernel(%arg0: memref<16x16xf32, #tpu.memory_space<vmem>>, %arg1: memref<368x128xf32, #tpu.memory_space<vmem>>, %arg2: memref<16x32xf32, #tpu.memory_space<vmem>>) attributes {dimension_semantics = [], scalar_prefetch = 0 : i64, scratch_operands = 0 : i64, tpu.core_type = #tpu.core_type<tc>} {
    %c0 = arith.constant 0 : index
    %c0_0 = arith.constant 0 : index
    %0 = vector.load %arg0[%c0, %c0_0] : memref<16x16xf32, #tpu.memory_space<vmem>>, vector<16x16xf32>
    %c144 = arith.constant 144 : index
    %c0_1 = arith.constant 0 : index
    %1 = vector.load %arg1[%c144, %c0_1] : memref<368x128xf32, #tpu.memory_space<vmem>>, vector<1x32xf32>
    %c144_2 = arith.constant 144 : index
    %c32 = arith.constant 32 : index
    %2 = vector.load %arg1[%c144_2, %c32] : memref<368x128xf32, #tpu.memory_space<vmem>>, vector<1x32xf32>
    %c0_3 = arith.constant 0 : index
    %c0_4 = arith.constant 0 : index
    %3 = vector.load %arg1[%c0_3, %c0_4] : memref<368x128xf32, #tpu.memory_space<vmem>>, vector<48x64xf32>
    %4 = arith.truncf %3 : vector<48x64xf32> to vector<48x64xbf16>
    %c352 = arith.constant 352 : index
    %c1 = arith.constant 1 : index
    %5 = vector.load %arg1[%c352, %c1] : memref<368x128xf32, #tpu.memory_space<vmem>>, vector<16x1xf32>
    %c2_i32 = arith.constant 2 : i32
    %6 = tpu.dynamic_rotate %0 by %c2_i32 dim 0 : vector<16x16xf32>, i32 -> vector<16x16xf32>
    %7 = vector.broadcast %5 : vector<16x1xf32> to vector<16x16xf32>
    %8 = arith.mulf %6, %7 : vector<16x16xf32>
    %c352_5 = arith.constant 352 : index
    %c0_6 = arith.constant 0 : index
    %9 = vector.load %arg1[%c352_5, %c0_6] : memref<368x128xf32, #tpu.memory_space<vmem>>, vector<16x1xf32>
    %c1_i32 = arith.constant 1 : i32
    %10 = tpu.dynamic_rotate %0 by %c1_i32 dim 0 : vector<16x16xf32>, i32 -> vector<16x16xf32>
    %11 = vector.broadcast %9 : vector<16x1xf32> to vector<16x16xf32>
    %12 = arith.mulf %10, %11 : vector<16x16xf32>
    %13 = tpu.concatenate %8, %12, %0 in 1 : vector<16x16xf32>, vector<16x16xf32>, vector<16x16xf32> -> vector<16x48xf32>
    %14 = arith.truncf %13 : vector<16x48xf32> to vector<16x48xbf16>
    %cst = arith.constant dense<0.000000e+00> : vector<16x64xf32>
    %15 = tpu.matmul %14, %4, %cst {dimension_numbers = #tpu.dot_dimension_numbers<[1], [0], [0], [1], [0, 0, 1, 1], [], []>} : vector<16x48xbf16>, vector<48x64xbf16>, vector<16x64xf32> -> vector<16x64xf32>
    %16 = vector.extract_strided_slice %15 {offsets = [0, 0], sizes = [16, 32], strides = [1, 1]} : vector<16x64xf32> to vector<16x32xf32>
    %17 = vector.broadcast %1 : vector<1x32xf32> to vector<16x32xf32>
    %18 = arith.addf %16, %17 : vector<16x32xf32>
    %cst_7 = arith.constant 0.000000e+00 : f32
    %19 = vector.broadcast %cst_7 : f32 to vector<16x32xf32>
    %20 = arith.maximumf %18, %19 : vector<16x32xf32>
    %c144_8 = arith.constant 144 : index
    %c64 = arith.constant 64 : index
    %21 = vector.load %arg1[%c144_8, %c64] : memref<368x128xf32, #tpu.memory_space<vmem>>, vector<1x32xf32>
    %22 = vector.extract_strided_slice %15 {offsets = [0, 32], sizes = [16, 32], strides = [1, 1]} : vector<16x64xf32> to vector<16x32xf32>
    %23 = vector.broadcast %21 : vector<1x32xf32> to vector<16x32xf32>
    %24 = arith.addf %22, %23 : vector<16x32xf32>
    %c48 = arith.constant 48 : index
    %c0_9 = arith.constant 0 : index
    %25 = vector.load %arg1[%c48, %c0_9] : memref<368x128xf32, #tpu.memory_space<vmem>>, vector<96x32xf32>
    %26 = arith.truncf %25 : vector<96x32xf32> to vector<96x32xbf16>
    %c352_10 = arith.constant 352 : index
    %c1_11 = arith.constant 1 : index
    %27 = vector.load %arg1[%c352_10, %c1_11] : memref<368x128xf32, #tpu.memory_space<vmem>>, vector<16x1xf32>
    %c2_i32_12 = arith.constant 2 : i32
    %28 = tpu.dynamic_rotate %20 by %c2_i32_12 dim 0 : vector<16x32xf32>, i32 -> vector<16x32xf32>
    %29 = vector.broadcast %27 : vector<16x1xf32> to vector<16x32xf32>
    %30 = arith.mulf %28, %29 : vector<16x32xf32>
    %c352_13 = arith.constant 352 : index
    %c0_14 = arith.constant 0 : index
    %31 = vector.load %arg1[%c352_13, %c0_14] : memref<368x128xf32, #tpu.memory_space<vmem>>, vector<16x1xf32>
    %c1_i32_15 = arith.constant 1 : i32
    %32 = tpu.dynamic_rotate %20 by %c1_i32_15 dim 0 : vector<16x32xf32>, i32 -> vector<16x32xf32>
    %33 = vector.broadcast %31 : vector<16x1xf32> to vector<16x32xf32>
    %34 = arith.mulf %32, %33 : vector<16x32xf32>
    %35 = tpu.concatenate %30, %34, %20 in 1 : vector<16x32xf32>, vector<16x32xf32>, vector<16x32xf32> -> vector<16x96xf32>
    %36 = arith.truncf %35 : vector<16x96xf32> to vector<16x96xbf16>
    %cst_16 = arith.constant dense<0.000000e+00> : vector<16x32xf32>
    %37 = tpu.matmul %36, %26, %cst_16 {dimension_numbers = #tpu.dot_dimension_numbers<[1], [0], [0], [1], [0, 0, 1, 1], [], []>} : vector<16x96xbf16>, vector<96x32xbf16>, vector<16x32xf32> -> vector<16x32xf32>
    %38 = vector.broadcast %2 : vector<1x32xf32> to vector<16x32xf32>
    %39 = arith.addf %37, %38 : vector<16x32xf32>
    %cst_17 = arith.constant 0.000000e+00 : f32
    %40 = vector.broadcast %cst_17 : f32 to vector<16x32xf32>
    %41 = arith.maximumf %39, %40 : vector<16x32xf32>
    %42 = arith.addf %41, %24 : vector<16x32xf32>
    %cst_18 = arith.constant 0.000000e+00 : f32
    %43 = vector.broadcast %cst_18 : f32 to vector<16x32xf32>
    %44 = arith.maximumf %42, %43 : vector<16x32xf32>
    %c344 = arith.constant 344 : index
    %c0_19 = arith.constant 0 : index
    %45 = vector.load %arg1[%c344, %c0_19] : memref<368x128xf32, #tpu.memory_space<vmem>>, vector<1x32xf32>
    %c344_20 = arith.constant 344 : index
    %c32_21 = arith.constant 32 : index
    %46 = vector.load %arg1[%c344_20, %c32_21] : memref<368x128xf32, #tpu.memory_space<vmem>>, vector<1x32xf32>
    %c152 = arith.constant 152 : index
    %c0_22 = arith.constant 0 : index
    %47 = vector.load %arg1[%c152, %c0_22] : memref<368x128xf32, #tpu.memory_space<vmem>>, vector<96x32xf32>
    %48 = arith.truncf %47 : vector<96x32xf32> to vector<96x32xbf16>
    %c352_23 = arith.constant 352 : index
    %c2 = arith.constant 2 : index
    %49 = vector.load %arg1[%c352_23, %c2] : memref<368x128xf32, #tpu.memory_space<vmem>>, vector<16x1xf32>
    %c4_i32 = arith.constant 4 : i32
    %50 = tpu.dynamic_rotate %44 by %c4_i32 dim 0 : vector<16x32xf32>, i32 -> vector<16x32xf32>
    %51 = vector.broadcast %49 : vector<16x1xf32> to vector<16x32xf32>
    %52 = arith.mulf %50, %51 : vector<16x32xf32>
    %c352_24 = arith.constant 352 : index
    %c1_25 = arith.constant 1 : index
    %53 = vector.load %arg1[%c352_24, %c1_25] : memref<368x128xf32, #tpu.memory_space<vmem>>, vector<16x1xf32>
    %c2_i32_26 = arith.constant 2 : i32
    %54 = tpu.dynamic_rotate %44 by %c2_i32_26 dim 0 : vector<16x32xf32>, i32 -> vector<16x32xf32>
    %55 = vector.broadcast %53 : vector<16x1xf32> to vector<16x32xf32>
    %56 = arith.mulf %54, %55 : vector<16x32xf32>
    %57 = tpu.concatenate %52, %56, %44 in 1 : vector<16x32xf32>, vector<16x32xf32>, vector<16x32xf32> -> vector<16x96xf32>
    %58 = arith.truncf %57 : vector<16x96xf32> to vector<16x96xbf16>
    %cst_27 = arith.constant dense<0.000000e+00> : vector<16x32xf32>
    %59 = tpu.matmul %58, %48, %cst_27 {dimension_numbers = #tpu.dot_dimension_numbers<[1], [0], [0], [1], [0, 0, 1, 1], [], []>} : vector<16x96xbf16>, vector<96x32xbf16>, vector<16x32xf32> -> vector<16x32xf32>
    %60 = vector.broadcast %45 : vector<1x32xf32> to vector<16x32xf32>
    %61 = arith.addf %59, %60 : vector<16x32xf32>
    %cst_28 = arith.constant 0.000000e+00 : f32
    %62 = vector.broadcast %cst_28 : f32 to vector<16x32xf32>
    %63 = arith.maximumf %61, %62 : vector<16x32xf32>
    %c248 = arith.constant 248 : index
    %c0_29 = arith.constant 0 : index
    %64 = vector.load %arg1[%c248, %c0_29] : memref<368x128xf32, #tpu.memory_space<vmem>>, vector<96x32xf32>
    %65 = arith.truncf %64 : vector<96x32xf32> to vector<96x32xbf16>
    %c352_30 = arith.constant 352 : index
    %c2_31 = arith.constant 2 : index
    %66 = vector.load %arg1[%c352_30, %c2_31] : memref<368x128xf32, #tpu.memory_space<vmem>>, vector<16x1xf32>
    %c4_i32_32 = arith.constant 4 : i32
    %67 = tpu.dynamic_rotate %63 by %c4_i32_32 dim 0 : vector<16x32xf32>, i32 -> vector<16x32xf32>
    %68 = vector.broadcast %66 : vector<16x1xf32> to vector<16x32xf32>
    %69 = arith.mulf %67, %68 : vector<16x32xf32>
    %c352_33 = arith.constant 352 : index
    %c1_34 = arith.constant 1 : index
    %70 = vector.load %arg1[%c352_33, %c1_34] : memref<368x128xf32, #tpu.memory_space<vmem>>, vector<16x1xf32>
    %c2_i32_35 = arith.constant 2 : i32
    %71 = tpu.dynamic_rotate %63 by %c2_i32_35 dim 0 : vector<16x32xf32>, i32 -> vector<16x32xf32>
    %72 = vector.broadcast %70 : vector<16x1xf32> to vector<16x32xf32>
    %73 = arith.mulf %71, %72 : vector<16x32xf32>
    %74 = tpu.concatenate %69, %73, %63 in 1 : vector<16x32xf32>, vector<16x32xf32>, vector<16x32xf32> -> vector<16x96xf32>
    %75 = arith.truncf %74 : vector<16x96xf32> to vector<16x96xbf16>
    %cst_36 = arith.constant dense<0.000000e+00> : vector<16x32xf32>
    %76 = tpu.matmul %75, %65, %cst_36 {dimension_numbers = #tpu.dot_dimension_numbers<[1], [0], [0], [1], [0, 0, 1, 1], [], []>} : vector<16x96xbf16>, vector<96x32xbf16>, vector<16x32xf32> -> vector<16x32xf32>
    %77 = vector.broadcast %46 : vector<1x32xf32> to vector<16x32xf32>
    %78 = arith.addf %76, %77 : vector<16x32xf32>
    %cst_37 = arith.constant 0.000000e+00 : f32
    %79 = vector.broadcast %cst_37 : f32 to vector<16x32xf32>
    %80 = arith.maximumf %78, %79 : vector<16x32xf32>
    %81 = arith.addf %80, %44 : vector<16x32xf32>
    %cst_38 = arith.constant 0.000000e+00 : f32
    %82 = vector.broadcast %cst_38 : f32 to vector<16x32xf32>
    %83 = arith.maximumf %81, %82 : vector<16x32xf32>
    %cst_39 = arith.constant 5.65685415 : f32
    %84 = vector.broadcast %cst_39 : f32 to vector<16x32xf32>
    %85 = arith.mulf %83, %84 : vector<16x32xf32>
    %c0_40 = arith.constant 0 : index
    %c0_41 = arith.constant 0 : index
    %86 = vector.load %arg2[%c0_40, %c0_41] : memref<16x32xf32, #tpu.memory_space<vmem>>, vector<16x32xf32>
    tpu.vector_store %arg2[%c0_40, %c0_41], %85 {strides = array<i32>} : memref<16x32xf32, #tpu.memory_space<vmem>>, vector<16x32xf32>,
    return
  }
}

</mosaic_0001>

<bundles_post_ra>
// kernel: temb_forward.1
= control target key start
LH: loop header
LB: loop body
LE: loop exit
PB: predicated region body
PF: predicated region fallthrough
CT: control target
= control target key end

     0   :  { %7 = vsyncpa [#allocation3], 0  ;;  %s714_s0 = inlined_call_operand.hbm [shape: f32[16,16], index: 0, kind: input, shape index: {}]   ;;  %s715_s1 = inlined_call_operand.hbm [shape: f32[368,128], index: 1, kind: input, shape index: {}]   ;;  %s716_s2 = inlined_call_operand.hbm [shape: f32[16,32], index: 2, kind: output, shape index: {}]  }
   0x1   :  { %8 = vsyncpa [#allocation6], 0 }
   0x2   :  { %9 = vsyncpa [#allocation4], 0  ;;  %s14_s11 = sshll.u32 %s714_s0, 4  ;;  %s552_s12 = smov [#allocation2]   ;;  %s15_s11 = int_to_ptr.hbm [resolvable:$true] %s14_s11 }
   0x3   :  { %s16_s13 = sshll.u32 %s552_s12, 4  ;;  %s27_s16 = sshll.u32 %s715_s1, 4  ;;  %s17_s13 = int_to_ptr.vmem [resolvable:$true] %s16_s13  ;;  %s28_s16 = int_to_ptr.hbm [resolvable:$true] %s27_s16 }
   0x4   :  { %s553_s17 = smov 128   ;;  %s554_s18 = smov 8  }
   0x5   :  { %22 = dma.hbm_to_vmem [thread:$0]  %s15_s11, 256, %s17_s13, [#allocation3], %s553_s17, %s553_s17, %s554_s18  }
   0x6   :  { %s555_s19 = smov [#allocation5]  }
   0x7   :  { %s29_s20 = sshll.u32 %s555_s19, 4  ;;  %s30_s20 = int_to_ptr.vmem [resolvable:$true] %s29_s20 }
   0x8   :  { %35 = dma.hbm_to_vmem [thread:$0]  %s28_s16, 5888, %s30_s20, [#allocation6], %s553_s17, %s553_s17, %s554_s18  }
   0x9   :  { %546 = dma.done.wait [#allocation3], 256  }
   0xa   :  { %547 = vsyncadd [#allocation3], 4294967040 }
   0xb   :  { %548 = dma.done.wait [#allocation6], 5888  }
   0xc   :  { %549 = vsyncadd [#allocation6], 4294961408  ;;  %v556_v0 = vmov 0   ;;  %v557_v1 = vmov 1   ;;  %v591_v2 = vld [vmem:[#allocation5 + $0x160] sm:$0xff]  ;;  %v595_v3 = vld [vmem:[#allocation5 + $0x168] sm:$0xff]  ;;  %v61_v4 = vlaneseq }
   0xd   :  { %428 = vset.pattern.permute.xlu0 %v556_v0  ;;  %429 = vset.pattern.permute.xlu1 %v557_v1  ;;  %v45_v6 = vld [vmem:[#allocation2] sm:$0xff]  ;;  %v46_v7 = vld [vmem:[#allocation2 + $0x8] sm:$0xff]  ;;  %s558_s0 = smov 16   ;;  %s559_s1 = smov 32   ;;  %v52_v22 = vld [vmem:[#allocation5 + $0x20] sm:$0xff]  ;;  %vm109_vm2 = vcmask 130048  }
   0xe   :  { %84 = vperm.xlu0 %428, %v591_v2   ;;  %68 = vperm.xlu1 %429, %v591_v2   ;;  %v599_v5 = vshrl.u32 %v61_v4, 7  ;;  %v59_v8 = vrot.slane %v45_v6, 6  ;;  %v60_v9 = vrot.slane %v46_v7, 6  ;;  %v78_v13 = vrot.slane %v45_v6, 7  ;;  %v53_v23 = vld [vmem:[#allocation5 + $0x28] sm:$0xff]  ;;  %v50_v25 = vld [vmem:[#allocation5 + $0x10] sm:$0xff] }
   0xf   :  { %v79_v14 = vrot.slane %v46_v7, 7  ;;  %v435_v21 = vpack.i.bf16 %v46_v7, %v45_v6  ;;  %v56_v24 = vpack.c.bf16 %v53_v23, %v52_v22  ;;  %v51_v26 = vld [vmem:[#allocation5 + $0x18] sm:$0xff]  ;;  %v48_v28 = vld [vmem:[#allocation5] sm:$0xff]  ;;  %v49_v29 = vld [vmem:[#allocation5 + $0x8] sm:$0xff]  ;;  %s560_s21 = smov 96   ;;  %vm112_vm3 = vcmask 261120  }
  0x10   :  { %vm63_vm0 = vcmp.lt.s32.totalorder %v599_v5, 2  ;;  %vm80_vm1 = vcmp.lt.s32.totalorder %v599_v5, 1  ;;  %v55_v27 = vpack.c.bf16 %v51_v26, %v50_v25  ;;  %v54_v30 = vpack.c.bf16 %v49_v29, %v48_v28  ;;  %v472_v31 = vld [vmem:[#allocation5 + $0x90] ss:$0 sm:$0xff]  ;;  %v155_v47 = vld [vmem:[#allocation5 + $0x80] sm:$0xff]  ;;  %v156_v48 = vld [vmem:[#allocation5 + $0x88] sm:$0xff] }
  0x11   :  { %v65_v10 = vsel %vm63_vm0, %v60_v9, %v59_v8  ;;  %v64_v11 = vsel %vm63_vm0, %v59_v8, %v60_v9  ;;  %v82_v15 = vsel %vm80_vm1, %v79_v14, %v78_v13  ;;  %v81_v16 = vsel %vm80_vm1, %v78_v13, %v79_v14  ;;  %125 = vmatpush.bf16.msra.mxu0 %v56_v24  ;;  %v153_v49 = vld [vmem:[#allocation5 + $0x70] sm:$0xff]  ;;  %v154_v51 = vld [vmem:[#allocation5 + $0x78] sm:$0xff]  ;;  %v151_v54 = vld [vmem:[#allocation5 + $0x60] sm:$0xff]  ;;  %s561_s22 = smov 64   ;;  %s563_s23 = smov [#allocation7]  }
  0x12   :  { %vm116_vm4 = vcmask 392192   ;;  %v162_v50 = vpack.c.bf16 %v156_v48, %v155_v47  ;;  %v161_v52 = vpack.c.bf16 %v154_v51, %v153_v49  ;;  %v152_v55 = vld [vmem:[#allocation5 + $0x68] sm:$0xff]  ;;  %v562_v25 = vmov 2   ;;  %s396_s24 = sshll.u32 %s563_s23, 4  ;;  %s398_s27 = sshll.u32 %s716_s2, 4  ;;  %s397_s24 = int_to_ptr.vmem [resolvable:$true] %s396_s24  ;;  %s399_s27 = int_to_ptr.hbm [resolvable:$true] %s398_s27 }
  0x13   :  { %v160_v56 = vpack.c.bf16 %v152_v55, %v151_v54  ;;  %v148_v22 = vld [vmem:[#allocation5 + $0x48] sm:$0xff]  ;;  %450 = vset.pattern.permute.xlu2 %v562_v25  ;;  %vm193_vm5 = vcmask 523264   ;;  %vm197_vm6 = vcmask 785408   ;;  %vm250_vm7 = vcmp.lt.s32.totalorder %v599_v5, 4  ;;  %v314_v5 = vld [vmem:[#allocation5 + $0x118] sm:$0xff] }
  0x14   :  { %203 = vmatpush.bf16.msra.mxu1 %v162_v50 }
  0x15   :  { %126 = vmatpush.bf16.msra.mxu0 %v55_v27 }
  0x16   :  { %88 = vperm.xlu0 %428, %v595_v3   ;;  %73 = vperm.xlu1 %429, %v595_v3  }
  0x18   :  { %204 = vmatpush.bf16.msra.mxu1 %v161_v52 }
  0x19   :  { %127 = vmatpush.bf16.msra.mxu0 %v54_v30 }
  0x1c   :  { %205 = vmatpush.bf16.msra.mxu1 %v160_v56 }
  0x1e   :  { %451 = vset.pattern.permute.xlu0 %v562_v25 }
  0x80   :  { %v606_v12 = vpop.permute.xlu0 %84  ;;  %v619_v32 = vpop.permute.xlu1 %68 }
  0x81   :  { %v91_v18 = vmul.f32 %v606_v12, %v82_v15  ;;  %v76_v35 = vmul.f32 %v619_v32, %v65_v10 }
  0x88   :  { %v613_v17 = vpop.permute.xlu0 %88  ;;  %v621_v34 = vpop.permute.xlu1 %73 }
  0x89   :  { %v92_v19 = vmul.f32 %v613_v17, %v81_v16  ;;  %v77_v36 = vmul.f32 %v621_v34, %v64_v11 }
  0x8b   :  { %v430_v20 = vpack.i.bf16 %v92_v19, %v91_v18  ;;  %v149_v18 = vld [vmem:[#allocation5 + $0x50] sm:$0xff]  ;;  %v150_v19 = vld [vmem:[#allocation5 + $0x58] sm:$0xff] }
  0x8d   :  { %431 = vrot.lane.b32.xlu2 %v430_v20, %s558_s0  ;;  %v159_v20 = vpack.c.bf16 %v150_v19, %v149_v18  ;;  %v473_v18 = vld [vmem:[#allocation5 + $0x158] ss:$0 sm:$0xff] }
  0x8f   :  { %206 = vmatpush.bf16.msra.mxu1 %v159_v20 }
  0x95   :  { %436 = vrot.lane.b32.xlu2 %v435_v21, %s559_s1  ;;  %v147_v21 = vld [vmem:[#allocation5 + $0x40] sm:$0xff] }
  0x96   :  { %v158_v23 = vpack.c.bf16 %v148_v22, %v147_v21 }
  0x98   :  { %207 = vmatpush.bf16.msra.mxu1 %v158_v23 }
  0x9d   :  { %140 = vrot.lane.b32.xlu2 %v472_v31, %s560_s21 }
  0xa5   :  { %254 = vperm.xlu2 %450, %v591_v2  }
  0xe7   :  { %v432_v33 = vpop.permute.xlu2 %431 }
  0xe8   :  { %v434_v37 = vunpack.i.h.bf16 %v432_v33  ;;  %v433_v38 = vunpack.i.l.bf16 %v432_v33 }
  0xea   :  { %v110_v42 = vsel %vm109_vm2, %v76_v35, %v433_v38  ;;  %v111_v43 = vsel %vm109_vm2, %v77_v36, %v434_v37 }
  0xef   :  { %v437_v39 = vpop.permute.xlu2 %436 }
  0xf0   :  { %v439_v40 = vunpack.i.h.bf16 %v437_v39  ;;  %v438_v41 = vunpack.i.l.bf16 %v437_v39 }
  0xf2   :  { %v113_v44 = vsel %vm112_vm3, %v110_v42, %v438_v41  ;;  %v114_v45 = vsel %vm112_vm3, %v111_v43, %v439_v40 }
  0xf3   :  { %v115_v46 = vpack.c.bf16 %v114_v45, %v113_v44 }
  0xf5   :  { %412 = vmatmul.msk.bf16.vlgmr.msra.gmra.mxu0 %vm116_vm4, %v115_v46 }
  0xf7   :  { %v141_v14 = vpop.permute.xlu2 %140 }
  0xff   :  { %v667_v19 = vpop.permute.xlu2 %254 }
 0x172   :  { %v129_v53 = vpop.f32.mrf.mxu0 }
 0x173   :  { %v135_v57 = vadd.f32 %v472_v31, %v129_v53  ;;  %v143_v16 = vadd.f32 %v141_v14, %v129_v53 }
 0x175   :  { %v137_v58 = vmax.f32 %v135_v57, 0.0 }
 0x177   :  { %v163_v62 = vrot.slane %v137_v58, 6  ;;  %v169_v63 = vrot.slane %v137_v58, 7 }
 0x17a   :  { %v131_v59 = vpop.f32.mrf.mxu0 }
 0x17b   :  { %v136_v60 = vadd.f32 %v472_v31, %v131_v59  ;;  %v144_v15 = vadd.f32 %v141_v14, %v131_v59  ;;  %v240_v59 = vld [vmem:[#allocation5 + $0xe8] sm:$0xff] }
 0x17d   :  { %v138_v61 = vmax.f32 %v136_v60, 0.0  ;;  %v241_v60 = vld [vmem:[#allocation5 + $0xf0] sm:$0xff] }
 0x17f   :  { %v164_v0 = vrot.slane %v138_v61, 6  ;;  %v170_v1 = vrot.slane %v138_v61, 7  ;;  %v445_v4 = vpack.i.bf16 %v138_v61, %v137_v58  ;;  %v238_v61 = vld [vmem:[#allocation5 + $0xd8] sm:$0xff] }
 0x181   :  { %v165_v6 = vsel %vm63_vm0, %v163_v62, %v164_v0  ;;  %v166_v7 = vsel %vm63_vm0, %v164_v0, %v163_v62  ;;  %446 = vrot.lane.b32.xlu1 %v445_v4, %s561_s22  ;;  %v171_v8 = vsel %vm80_vm1, %v169_v63, %v170_v1  ;;  %v172_v9 = vsel %vm80_vm1, %v170_v1, %v169_v63  ;;  %v239_v63 = vld [vmem:[#allocation5 + $0xe0] sm:$0xff]  ;;  %v236_v1 = vld [vmem:[#allocation5 + $0xc8] sm:$0xff]  ;;  %v237_v4 = vld [vmem:[#allocation5 + $0xd0] sm:$0xff] }
 0x182   :  { %v173_v10 = vmul.f32 %v172_v9, %v606_v12  ;;  %v174_v11 = vmul.f32 %v171_v8, %v613_v17  ;;  %v145_v12 = vld [vmem:[#allocation5 + $0x30] sm:$0xff]  ;;  %v146_v17 = vld [vmem:[#allocation5 + $0x38] sm:$0xff]  ;;  %v167_v28 = vmul.f32 %v166_v7, %v619_v32  ;;  %v168_v31 = vmul.f32 %v165_v6, %v621_v34  ;;  %v235_v8 = vld [vmem:[#allocation5 + $0xc0] sm:$0xff] }
 0x183   :  { %v157_v24 = vpack.c.bf16 %v146_v17, %v145_v12  ;;  %v247_v62 = vpack.c.bf16 %v241_v60, %v240_v59  ;;  %v246_v0 = vpack.c.bf16 %v239_v63, %v238_v61  ;;  %v245_v6 = vpack.c.bf16 %v237_v4, %v236_v1  ;;  %v234_v7 = vld [vmem:[#allocation5 + $0xb8] sm:$0xff]  ;;  %v319_v60 = vld [vmem:[#allocation5 + $0x140] sm:$0xff]  ;;  %v317_v63 = vld [vmem:[#allocation5 + $0x130] sm:$0xff] }
 0x184   :  { %v440_v13 = vpack.i.bf16 %v174_v11, %v173_v10  ;;  %v244_v9 = vpack.c.bf16 %v235_v8, %v234_v7  ;;  %v232_v10 = vld [vmem:[#allocation5 + $0xa8] sm:$0xff]  ;;  %v233_v11 = vld [vmem:[#allocation5 + $0xb0] sm:$0xff]  ;;  %v315_v1 = vld [vmem:[#allocation5 + $0x120] sm:$0xff] }
 0x185   :  { %208 = vmatpush.bf16.msra.mxu1 %v157_v24  ;;  %296 = vmatpush.bf16.msra.mxu2 %v247_v62  ;;  %v316_v62 = vld [vmem:[#allocation5 + $0x128] sm:$0xff]  ;;  %v310_v7 = vld [vmem:[#allocation5 + $0xf8] sm:$0xff]  ;;  %v311_v8 = vld [vmem:[#allocation5 + $0x100] sm:$0xff] }
 0x186   :  { %441 = vrot.lane.b32.xlu0 %v440_v13, %s559_s1  ;;  %v243_v13 = vpack.c.bf16 %v233_v11, %v232_v10  ;;  %v312_v4 = vld [vmem:[#allocation5 + $0x108] sm:$0xff] }
 0x189   :  { %221 = vrot.lane.b32.xlu1 %v144_v15, %s560_s21  ;;  %297 = vmatpush.bf16.msra.mxu2 %v246_v0  ;;  %v231_v15 = vld [vmem:[#allocation5 + $0xa0] sm:$0xff]  ;;  %v325_v0 = vpack.c.bf16 %v317_v63, %v316_v62 }
 0x18d   :  { %298 = vmatpush.bf16.msra.mxu2 %v245_v6 }
 0x18e   :  { %219 = vrot.lane.b32.xlu0 %v143_v16, %s560_s21 }
 0x191   :  { %299 = vmatpush.bf16.msra.mxu2 %v244_v9  ;;  %v322_v9 = vpack.c.bf16 %v311_v8, %v310_v7 }
 0x195   :  { %300 = vmatpush.bf16.msra.mxu2 %v243_v13 }
 0x196   :  { %258 = vperm.xlu0 %451, %v595_v3  }
 0x19e   :  { %362 = vrot.lane.b32.xlu0 %v473_v18, %s560_s21 }
 0x1f3   :  { %v447_v26 = vpop.permute.xlu1 %446 }
 0x1f4   :  { %v449_v33 = vunpack.i.h.bf16 %v447_v26  ;;  %v448_v35 = vunpack.i.l.bf16 %v447_v26 }
 0x1f8   :  { %v442_v27 = vpop.permute.xlu0 %441 }
 0x1f9   :  { %v444_v29 = vunpack.i.h.bf16 %v442_v27  ;;  %v443_v30 = vunpack.i.l.bf16 %v442_v27 }
 0x1fb   :  { %v191_v36 = vsel %vm112_vm3, %v167_v28, %v443_v30  ;;  %v192_v37 = vsel %vm112_vm3, %v168_v31, %v444_v29  ;;  %v222_v47 = vpop.permute.xlu1 %221 }
 0x1fc   :  { %v194_v38 = vsel %vm193_vm5, %v191_v36, %v448_v35  ;;  %v195_v3 = vsel %vm193_vm5, %v192_v37, %v449_v33 }
 0x1fd   :  { %v196_v2 = vpack.c.bf16 %v195_v3, %v194_v38 }
 0x1ff   :  { %413 = vmatmul.msk.bf16.vlgmr.msra.gmra.mxu1 %vm197_vm6, %v196_v2 }
 0x200   :  { %v220_v42 = vpop.permute.xlu0 %219 }
 0x208   :  { %v674_v23 = vpop.permute.xlu0 %258 }
 0x27c   :  { %v210_v39 = vpop.f32.mrf.mxu1 }
 0x27d   :  { %v211_v40 = vadd.f32 %v210_v39, %v141_v14 }
 0x27f   :  { %v215_v41 = vmax.f32 %v211_v40, 0.0 }
 0x281   :  { %v225_v44 = vadd.f32 %v220_v42, %v215_v41 }
 0x283   :  { %v650_v48 = vmax.f32 %v225_v44, 0.0 }
 0x284   :  { %v212_v43 = vpop.f32.mrf.mxu1 }
 0x285   :  { %v213_v45 = vadd.f32 %v212_v43, %v141_v14  ;;  %v263_v52 = vrot.slane %v650_v48, 6  ;;  %v230_v14 = vld [vmem:[#allocation5 + $0x98] sm:$0xff]  ;;  %v248_v21 = vrot.slane %v650_v48, 4 }
 0x286   :  { %v242_v16 = vpack.c.bf16 %v231_v15, %v230_v14 }
 0x287   :  { %v216_v46 = vmax.f32 %v213_v45, 0.0 }
 0x288   :  { %301 = vmatpush.bf16.msra.mxu2 %v242_v16 }
 0x289   :  { %v226_v49 = vadd.f32 %v222_v47, %v216_v46 }
 0x28b   :  { %v652_v50 = vmax.f32 %v226_v49, 0.0 }
 0x28d   :  { %v457_v51 = vpack.i.bf16 %v652_v50, %v650_v48  ;;  %v264_v53 = vrot.slane %v652_v50, 6  ;;  %v249_v20 = vrot.slane %v652_v50, 4 }
 0x28f   :  { %458 = vrot.lane.b32.xlu2 %v457_v51, %s561_s22  ;;  %v265_v54 = vsel %vm63_vm0, %v263_v52, %v264_v53  ;;  %v266_v55 = vsel %vm63_vm0, %v264_v53, %v263_v52  ;;  %v252_v22 = vsel %vm250_vm7, %v249_v20, %v248_v21  ;;  %v251_v12 = vsel %vm250_vm7, %v248_v21, %v249_v20 }
 0x290   :  { %v267_v56 = vmul.f32 %v266_v55, %v619_v32  ;;  %v268_v57 = vmul.f32 %v265_v54, %v621_v34  ;;  %v261_v25 = vmul.f32 %v667_v19, %v252_v22  ;;  %v262_v26 = vmul.f32 %v674_v23, %v251_v12 }
 0x292   :  { %v452_v58 = vpack.i.bf16 %v268_v57, %v267_v56  ;;  %v320_v56 = vld [vmem:[#allocation5 + $0x148] sm:$0xff]  ;;  %v321_v57 = vld [vmem:[#allocation5 + $0x150] sm:$0xff] }
 0x293   :  { %v327_v59 = vpack.c.bf16 %v321_v57, %v320_v56 }
 0x294   :  { %453 = vrot.lane.b32.xlu1 %v452_v58, %s559_s1  ;;  %v318_v58 = vld [vmem:[#allocation5 + $0x138] sm:$0xff] }
 0x295   :  { %370 = vmatpush.bf16.msra.mxu3 %v327_v59  ;;  %v326_v61 = vpack.c.bf16 %v319_v60, %v318_v58 }
 0x299   :  { %371 = vmatpush.bf16.msra.mxu3 %v326_v61 }
 0x29d   :  { %372 = vmatpush.bf16.msra.mxu3 %v325_v0 }
 0x2e9   :  { %v459_v17 = vpop.permute.xlu2 %458 }
 0x2ea   :  { %v461_v29 = vunpack.i.h.bf16 %v459_v17  ;;  %v460_v30 = vunpack.i.l.bf16 %v459_v17 }
 0x306   :  { %v454_v24 = vpop.permute.xlu1 %453 }
 0x307   :  { %v456_v27 = vunpack.i.h.bf16 %v454_v24  ;;  %v455_v28 = vunpack.i.l.bf16 %v454_v24 }
 0x309   :  { %v285_v31 = vsel %vm112_vm3, %v261_v25, %v455_v28  ;;  %v286_v33 = vsel %vm112_vm3, %v262_v26, %v456_v27  ;;  %v363_v25 = vpop.permute.xlu0 %362 }
 0x30a   :  { %v287_v35 = vsel %vm193_vm5, %v285_v31, %v460_v30  ;;  %v288_v36 = vsel %vm193_vm5, %v286_v33, %v461_v29 }
 0x30b   :  { %v289_v37 = vpack.c.bf16 %v288_v36, %v287_v35 }
 0x30d   :  { %414 = vmatmul.msk.bf16.vlgmr.msra.gmra.mxu2 %vm197_vm6, %v289_v37 }
 0x390   :  { %v303_v38 = vpop.f32.mrf.mxu2 }
 0x391   :  { %v304_v3 = vadd.f32 %v473_v18, %v303_v38 }
 0x393   :  { %v308_v2 = vmax.f32 %v304_v3, 0.0 }
 0x395   :  { %v328_v42 = vrot.slane %v308_v2, 4  ;;  %v334_v43 = vrot.slane %v308_v2, 6 }
 0x398   :  { %v305_v39 = vpop.f32.mrf.mxu2 }
 0x399   :  { %v306_v40 = vadd.f32 %v473_v18, %v305_v39 }
 0x39b   :  { %v309_v41 = vmax.f32 %v306_v40, 0.0 }
 0x39d   :  { %v329_v44 = vrot.slane %v309_v41, 4  ;;  %v335_v45 = vrot.slane %v309_v41, 6  ;;  %v467_v46 = vpack.i.bf16 %v309_v41, %v308_v2 }
 0x39f   :  { %v330_v47 = vsel %vm250_vm7, %v328_v42, %v329_v44  ;;  %v331_v49 = vsel %vm250_vm7, %v329_v44, %v328_v42  ;;  %468 = vrot.lane.b32.xlu2 %v467_v46, %s561_s22  ;;  %v336_v51 = vsel %vm63_vm0, %v334_v43, %v335_v45  ;;  %v337_v52 = vsel %vm63_vm0, %v335_v45, %v334_v43 }
 0x3a0   :  { %v338_v53 = vmul.f32 %v337_v52, %v619_v32  ;;  %v339_v54 = vmul.f32 %v336_v51, %v621_v34  ;;  %v324_v32 = vpack.c.bf16 %v315_v1, %v314_v5  ;;  %v313_v34 = vld [vmem:[#allocation5 + $0x110] sm:$0xff]  ;;  %v332_v15 = vmul.f32 %v331_v49, %v667_v19 }
 0x3a1   :  { %v323_v6 = vpack.c.bf16 %v313_v34, %v312_v4  ;;  %v333_v16 = vmul.f32 %v330_v47, %v674_v23 }
 0x3a2   :  { %v462_v55 = vpack.i.bf16 %v339_v54, %v338_v53  ;;  %373 = vmatpush.bf16.msra.mxu3 %v324_v32 }
 0x3a4   :  { %463 = vrot.lane.b32.xlu1 %v462_v55, %s559_s1 }
 0x3a6   :  { %374 = vmatpush.bf16.msra.mxu3 %v323_v6 }
 0x3aa   :  { %375 = vmatpush.bf16.msra.mxu3 %v322_v9 }
 0x3f9   :  { %v469_v10 = vpop.permute.xlu2 %468 }
 0x3fa   :  { %v471_v18 = vunpack.i.h.bf16 %v469_v10  ;;  %v470_v20 = vunpack.i.l.bf16 %v469_v10 }
 0x416   :  { %v464_v11 = vpop.permute.xlu1 %463 }
 0x417   :  { %v466_v13 = vunpack.i.h.bf16 %v464_v11  ;;  %v465_v14 = vunpack.i.l.bf16 %v464_v11 }
 0x419   :  { %v356_v21 = vsel %vm112_vm3, %v332_v15, %v465_v14  ;;  %v357_v22 = vsel %vm112_vm3, %v333_v16, %v466_v13 }
 0x41a   :  { %v358_v12 = vsel %vm193_vm5, %v356_v21, %v470_v20  ;;  %v359_v17 = vsel %vm193_vm5, %v357_v22, %v471_v18 }
 0x41b   :  { %v360_v24 = vpack.c.bf16 %v359_v17, %v358_v12 }
 0x41d   :  { %415 = vmatmul.msk.bf16.vlgmr.msra.gmra.mxu3 %vm197_vm6, %v360_v24 }
 0x4a0   :  { %v377_v26 = vpop.f32.mrf.mxu3 }
 0x4a1   :  { %v378_v27 = vadd.f32 %v377_v26, %v363_v25 }
 0x4a3   :  { %v382_v28 = vmax.f32 %v378_v27, 0.0 }
 0x4a5   :  { %v384_v19 = vadd.f32 %v382_v28, %v650_v48 }
 0x4a7   :  { %v386_v23 = vmax.f32 %v384_v19, 0.0 }
 0x4a8   :  { %v379_v29 = vpop.f32.mrf.mxu3 }
 0x4a9   :  { %v388_v30 = vmul.f32 5.656854, %v386_v23  ;;  %v380_v31 = vadd.f32 %v379_v29, %v363_v25 }
 0x4ab   :  { %390 = vst.msk [vmem:[#allocation7] sm:$0xff] %vm112_vm3, %v388_v30  ;;  %v383_v33 = vmax.f32 %v380_v31, 0.0 }
 0x4ad   :  { %v385_v35 = vadd.f32 %v383_v33, %v652_v50 }
 0x4af   :  { %v387_v36 = vmax.f32 %v385_v35, 0.0 }
 0x4b1   :  { %v389_v37 = vmul.f32 5.656854, %v387_v36 }
 0x4b3   :  { %391 = vst.msk [vmem:[#allocation7 + $0x8] sm:$0xff] %vm112_vm3, %v389_v37 }
 0x4b4   :  { %404 = dma.vmem_to_hbm [thread:$0]  %s397_s24, 256, %s399_s27, [#allocation4], %s553_s17, %s553_s17, %s554_s18  }
 0x4b5   :  { %550 = dma.done.wait [#allocation4], 256  }
 0x4b6   :  { %551 = vsyncadd [#allocation4], 4294967040 }
 0x4b7   :  { %409 = vsyncpa [#allocation3], 1 }
 0x4b8   :  { %410 = vsyncpa [#allocation6], 1 }
 0x4b9   :  { %411 = vsyncpa [#allocation4], 1 }

</bundles_post_ra>
